<compile_context>
chip_gen: v7x
topology: tpu7x:2x2x1
jax: 0.10.0
libtpu: 0.0.40
codegen_flags: <defaults>
</compile_context>

<pallas_src>
import functools
import math

import jax
import jax.numpy as jnp
from jax.experimental import pallas as pl
from jax.experimental.pallas import tpu as pltpu

_LANE = 128
_TM_INNER = 512                       # rows per in-kernel compute sub-block
_TM_MAX = 8192                        # never exceed this many rows per grid step
_STREAM_BYTES_TARGET = 2 * 1024 * 1024  # ~2 MiB per input stream per grid step
_EPS_DEFAULT = 1e-6


def _num_parallel_chunks():
    """Grid chunks for the leading 'parallel' axis (one per TensorCore)."""
    try:
        kind = jax.devices()[0].device_kind.lower()
    except Exception:
        return 2
    if "v7" in kind or "7x" in kind:
        return 2                      # v7x: 2 TensorCores per chip
    if any(tag in kind for tag in ("lite", "v5e", "v6")):
        return 1                      # v5e / v6e: single TensorCore
    return 2                          # v4 / v5p megacore & unknown chips: keep split


def _round_up(x, m):
    return ((x + m - 1) // m) * m


def _gdl_kernel(*refs, apply_sigmoid, has_mask, needs_mask, n_valid_rows,
                first_dirty_block, tm, tm_inner, steps_per_chunk):
    if has_mask:
        pred_ref, true_ref, mask_ref, out_ref, acc_pt, acc_p, acc_t = refs
    else:
        pred_ref, true_ref, out_ref, acc_pt, acc_p, acc_t = refs
        mask_ref = None

    c = pl.program_id(0)              # parallel chunk (megacore / 2-TC split)
    i = pl.program_id(1)              # sequential reduction step within the chunk

    @pl.when(i == 0)
    def _init():
        acc_pt[...] = jnp.zeros_like(acc_pt)
        acc_p[...] = jnp.zeros_like(acc_p)
        acc_t[...] = jnp.zeros_like(acc_t)

    num_sub = tm // tm_inner
    blk = c * steps_per_chunk + i     # logical (unclamped) block index

    def _vreg_sum(x):
        # (tm_inner, 128) f32 -> (8, 128): pure VPU adds over whole sublane tiles.
        return jnp.sum(x.reshape(tm_inner // 8, 8, _LANE), axis=0)

    def _accumulate(dirty):
        s_pt = jnp.zeros((8, _LANE), jnp.float32)
        s_p = jnp.zeros((8, _LANE), jnp.float32)
        s_t = jnp.zeros((8, _LANE), jnp.float32)
        for j in range(num_sub):      # static unroll; sub-blocks are vreg-friendly
            r0, r1 = j * tm_inner, (j + 1) * tm_inner
            p = pred_ref[r0:r1, :].astype(jnp.float32)
            if apply_sigmoid:
                p = jax.nn.sigmoid(p)
            if has_mask:
                p = p * mask_ref[r0:r1, :].astype(jnp.float32)
            t = true_ref[r0:r1, :].astype(jnp.float32)
            if dirty:
                grow = (blk * tm + r0
                        + jax.lax.broadcasted_iota(jnp.int32, (tm_inner, _LANE), 0))
                valid = grow < n_valid_rows
                # jnp.where (not multiply) so garbage/NaN in padded edge rows
                # cannot leak into the sums.
                p = jnp.where(valid, p, 0.0)
                t = jnp.where(valid, t, 0.0)
            s_pt = s_pt + _vreg_sum(p * t)
            s_p = s_p + _vreg_sum(p)
            s_t = s_t + _vreg_sum(t)
        acc_pt[...] += s_pt
        acc_p[...] += s_p
        acc_t[...] += s_t

    if needs_mask:
        # Only the blocks that actually touch the ragged / clamped tail pay for
        # the iota + compare + select work; clean blocks take the cheap branch.
        is_dirty = blk >= first_dirty_block

        @pl.when(jnp.logical_not(is_dirty))
        def _clean():
            _accumulate(False)

        @pl.when(is_dirty)
        def _dirty():
            _accumulate(True)
    else:
        _accumulate(False)

    @pl.when(i == pl.num_programs(1) - 1)
    def _finalize():
        # Three full (8,128) unmasked, lane-dense stores per chunk.
        out_ref[0, :, :] = acc_pt[...]
        out_ref[1, :, :] = acc_p[...]
        out_ref[2, :, :] = acc_t[...]


def _finish(inter, sum_p, sum_t, epsilon):
    w = 1.0 / jnp.maximum(sum_t * sum_t, epsilon)
    numer = inter * w
    denom = jnp.maximum((sum_p + sum_t) * w, epsilon)
    return (1.0 - 2.0 * (numer / denom)).astype(jnp.float32)


def _partial_sums(p, t, m, sigmoid_required):
    """Pure-JAX sums for tiny (tail / sub-lane) pieces."""
    pf = p.astype(jnp.float32)
    if sigmoid_required:
        pf = jax.nn.sigmoid(pf)
    if m is not None:
        pf = pf * m.astype(jnp.float32)
    tf = t.astype(jnp.float32)
    return jnp.sum(pf * tf), jnp.sum(pf), jnp.sum(tf)


def generalized_dice_loss(y_pred, y_true, mask=None, *, sigmoid_required=True,
                          epsilon=_EPS_DEFAULT):
    """JAX/Pallas equivalent of Generalized_Dice_Loss(sigmoid_required, epsilon)."""
    assert y_pred.shape == y_true.shape, "'y_pred' and 'y_true' must have the same shape"
    n = math.prod(y_pred.shape)

    if n == 0:
        # Empty input: all sums are zero -> dsc = 0 -> loss = 1.
        return jnp.float32(1.0)

    if mask is not None and mask.shape != y_pred.shape:
        mask = jnp.broadcast_to(mask, y_pred.shape)

    if n == 1:
        # Degenerate 1-element case (torch's cat((p, 1-p)) branch); pure JAX.
        p = y_pred.reshape(-1).astype(jnp.float32)
        if sigmoid_required:
            p = jax.nn.sigmoid(p)
        if mask is not None:
            p = p * mask.reshape(-1).astype(jnp.float32)
        p = jnp.concatenate([p, 1.0 - p])
        t = y_true.reshape(-1).astype(jnp.float32)
        t = jnp.concatenate([t, 1.0 - t])
        return _finish(jnp.sum(p * t), jnp.sum(p), jnp.sum(t), epsilon)

    # Flatten (free for contiguous arrays); keep native dtypes for streaming.
    p_flat = y_pred.reshape(-1)
    t_flat = y_true.reshape(-1)
    m_flat = mask.reshape(-1) if mask is not None else None

    rows = n // _LANE
    rem = n % _LANE
    aligned = rows * _LANE

    s_pt = s_p = s_t = jnp.float32(0.0)

    if rows > 0:
        def to2d(x):
            if rem:
                x = x[:aligned]
            return x.reshape(rows, _LANE)

        operands = [to2d(p_flat), to2d(t_flat)]
        if m_flat is not None:
            operands.append(to2d(m_flat))

        itemsizes = [jnp.dtype(op.dtype).itemsize for op in operands]
        sub_mult = 32 // min(itemsizes)    # native sublane packing: 8/16/32 rows

        if rows >= _TM_INNER:
            # ~2 MiB per (widest) input stream per grid step, in whole sub-blocks.
            tm_target = _STREAM_BYTES_TARGET // (_LANE * max(itemsizes))
            tm_target = max(_TM_INNER,
                            min(_TM_MAX, (tm_target // _TM_INNER) * _TM_INNER))
            tm = min(tm_target, _round_up(rows, _TM_INNER))
            tm_inner = _TM_INNER
        else:
            tm = _round_up(rows, sub_mult)
            tm_inner = tm

        n_blocks = (rows + tm - 1) // tm
        n_chunks = 2 if (n_blocks >= 2 and _num_parallel_chunks() >= 2) else 1
        spc = (n_blocks + n_chunks - 1) // n_chunks     # reduction steps per chunk
        first_dirty_block = rows // tm                  # first block needing masking
        needs_mask = (n_chunks * spc) > first_dirty_block
        last_blk = n_blocks - 1

        def blk_map(c, i):
            # Clamp so trailing (fully-masked) clamped steps never read OOB.
            return (jnp.minimum(c * spc + i, last_blk), 0)

        in_specs = [pl.BlockSpec((tm, _LANE), blk_map) for _ in operands]
        out_spec = pl.BlockSpec((None, 3, 8, _LANE), lambda c, i: (c, 0, 0, 0))

        kernel = functools.partial(
            _gdl_kernel,
            apply_sigmoid=sigmoid_required,
            has_mask=m_flat is not None,
            needs_mask=needs_mask,
            n_valid_rows=rows,
            first_dirty_block=first_dirty_block,
            tm=tm,
            tm_inner=tm_inner,
            steps_per_chunk=spc,
        )

        out_bytes = n_chunks * 3 * 8 * _LANE * 4
        in_bytes = sum(int(op.size) * it for op, it in zip(operands, itemsizes))
        cost = pl.CostEstimate(
            flops=int(5 * n),
            transcendentals=int(n if sigmoid_required else 0),
            bytes_accessed=int(in_bytes + out_bytes),
        )

        # Explicit VMEM budget: double-buffered inputs + tiny output/accumulators,
        # with headroom for compiler temporaries; capped well below v7x's 64 MiB.
        vmem_need = (2 * tm * _LANE * sum(itemsizes)
                     + 2 * 3 * 8 * _LANE * 4
                     + 3 * 8 * _LANE * 4)
        vmem_limit = int(min(40 * 2**20, max(vmem_need + 12 * 2**20, 16 * 2**20)))

        partials = pl.pallas_call(
            kernel,
            out_shape=jax.ShapeDtypeStruct((n_chunks, 3, 8, _LANE), jnp.float32),
            grid_spec=pltpu.PrefetchScalarGridSpec(
                num_scalar_prefetch=0,
                grid=(n_chunks, spc),
                in_specs=in_specs,
                out_specs=out_spec,
                scratch_shapes=[pltpu.VMEM((8, _LANE), jnp.float32)] * 3,
            ),
            compiler_params=pltpu.CompilerParams(
                dimension_semantics=("parallel", "arbitrary"),
                vmem_limit_bytes=vmem_limit,
            ),
            cost_estimate=cost,
        )(*operands)

        sums = jnp.sum(partials, axis=(0, 2, 3))   # [sum(p*t), sum(p), sum(t)]
        s_pt, s_p, s_t = sums[0], sums[1], sums[2]

    if rem:
        # <=127-element ragged tail: tiny pure-JAX epilogue instead of padding /
        # copying the full operands to reach lane alignment.
        tp = p_flat[aligned:]
        tt = t_flat[aligned:]
        tmsk = m_flat[aligned:] if m_flat is not None else None
        d_pt, d_p, d_t = _partial_sums(tp, tt, tmsk, sigmoid_required)
        s_pt = s_pt + d_pt
        s_p = s_p + d_p
        s_t = s_t + d_t

    return _finish(s_pt, s_p, s_t, epsilon)


def _gdl_ref(y_pred, y_true, mask=None, *, sigmoid_required=True, epsilon=_EPS_DEFAULT):
    """Pure-JAX reference mirroring the PyTorch forward."""
    p = y_pred.astype(jnp.float32)
    if sigmoid_required:
        p = jax.nn.sigmoid(p)
    if mask is not None:
        p = p * mask.astype(jnp.float32)
    p = p.reshape(-1)
    t = y_true.reshape(-1).astype(jnp.float32)
    if p.shape[0] == 1:
        p = jnp.concatenate([p, 1.0 - p])
        t = jnp.concatenate([t, 1.0 - t])
    s_t = jnp.sum(t)
    w = 1.0 / jnp.maximum(s_t * s_t, epsilon)
    inter = jnp.sum(p * t) * w
    denom = jnp.maximum(jnp.sum(p + t) * w, epsilon)
    return 1.0 - 2.0 * (inter / denom)


if __name__ == "__main__":
    key = jax.random.PRNGKey(0)
    k1, k2, k3, k4, k5 = jax.random.split(key, 5)

    # Case 1: (2,4,16,16) logits, sigmoid + mask (single clean block).
    shp1 = (2, 4, 16, 16)
    y_pred1 = jax.random.normal(k1, shp1, dtype=jnp.float32)
    y_true1 = (jax.random.uniform(k2, shp1) > 0.5).astype(jnp.float32)
    mask1 = (jax.random.uniform(k3, shp1) > 0.2).astype(jnp.float32)
    out1 = generalized_dice_loss(y_pred1, y_true1, mask1, sigmoid_required=True)
    jax.block_until_ready(out1)
    ref1 = _gdl_ref(y_pred1, y_true1, mask1, sigmoid_required=True)
    assert abs(float(out1) - float(ref1)) < 1e-4, (float(out1), float(ref1))

    # Case 2: probabilities, no sigmoid, no mask, ragged size (wrapper-tail path).
    shp2 = (2, 3, 7, 5)
    y_pred2 = jax.random.uniform(k4, shp2, dtype=jnp.float32)
    y_true2 = (jax.random.uniform(k5, shp2) > 0.5).astype(jnp.float32)
    out2 = generalized_dice_loss(y_pred2, y_true2, sigmoid_required=False)
    jax.block_until_ready(out2)
    ref2 = _gdl_ref(y_pred2, y_true2, sigmoid_required=False)
    assert abs(float(out2) - float(ref2)) < 1e-4, (float(out2), float(ref2))

    # Case 3: bf16 inputs, multi-sub-block with in-kernel edge-row masking.
    shp3 = (8, 4, 64, 65)
    k6, k7, _ = jax.random.split(k1, 3)
    y_pred3 = jax.random.normal(k6, shp3, dtype=jnp.bfloat16)
    y_true3 = (jax.random.uniform(k7, shp3) > 0.5).astype(jnp.bfloat16)
    out3 = generalized_dice_loss(y_pred3, y_true3, sigmoid_required=True)
    jax.block_until_ready(out3)
    ref3 = _gdl_ref(y_pred3, y_true3, sigmoid_required=True)
    assert abs(float(out3) - float(ref3)) < 2e-3, (float(out3), float(ref3))

    # Case 4: multi-block f32 -> exercises multi-step reduction, clean+dirty
    # branches, and the chunked parallel split on 2-TensorCore chips.
    shp4 = (4, 4, 160, 208)
    k8, k9 = jax.random.split(k2)
    y_pred4 = jax.random.normal(k8, shp4, dtype=jnp.float32)
    y_true4 = (jax.random.uniform(k9, shp4) > 0.5).astype(jnp.float32)
    out4 = generalized_dice_loss(y_pred4, y_true4, sigmoid_required=True)
    jax.block_until_ready(out4)
    ref4 = _gdl_ref(y_pred4, y_true4, sigmoid_required=True)
    assert abs(float(out4) - float(ref4)) < 2e-4, (float(out4), float(ref4))

    print("KERNEL_OK")
</pallas_src>

<mosaic_0001>
module attributes {stable_mosaic.version = 11 : i64} {
  func.func @_gdl_kernel(%arg0: i32, %arg1: i32, %arg2: memref<16x128xf32, #tpu.memory_space<vmem>>, %arg3: memref<16x128xf32, #tpu.memory_space<vmem>>, %arg4: memref<16x128xf32, #tpu.memory_space<vmem>>, %arg5: memref<1x3x8x128xf32, #tpu.memory_space<vmem>>, %arg6: memref<8x128xf32, #tpu.memory_space<vmem>>, %arg7: memref<8x128xf32, #tpu.memory_space<vmem>>, %arg8: memref<8x128xf32, #tpu.memory_space<vmem>>) attributes {dimension_semantics = [#tpu.dimension_semantics<parallel>, #tpu.dimension_semantics<arbitrary>], iteration_bounds = array<i64: 1, 1>, scalar_prefetch = 0 : i64, scratch_operands = 3 : i64, tpu.core_type = #tpu.core_type<tc>, window_params = [{transform_indices = @transform_0, window_bounds = array<i64: 16, 128>}, {transform_indices = @transform_1, window_bounds = array<i64: 16, 128>}, {transform_indices = @transform_2, window_bounds = array<i64: 16, 128>}, {transform_indices = @transform_3, window_bounds = array<i64: 1, 3, 8, 128>}]} {
    %c0_i32 = arith.constant 0 : i32
    %0 = arith.cmpi eq, %arg1, %c0_i32 : i32
    %1 = arith.extui %0 : i1 to i32
    %c0_i32_0 = arith.constant 0 : i32
    %2 = arith.cmpi ne, %1, %c0_i32_0 : i32
    scf.if %2 {
      %cst_26 = arith.constant 0.000000e+00 : f32
      %37 = vector.broadcast %cst_26 : f32 to vector<8x128xf32>
      %c0_27 = arith.constant 0 : index
      %c0_28 = arith.constant 0 : index
      %38 = vector.load %arg6[%c0_27, %c0_28] : memref<8x128xf32, #tpu.memory_space<vmem>>, vector<8x128xf32>
      tpu.vector_store %arg6[%c0_27, %c0_28], %37 {strides = array<i32>} : memref<8x128xf32, #tpu.memory_space<vmem>>, vector<8x128xf32>,
      %cst_29 = arith.constant 0.000000e+00 : f32
      %39 = vector.broadcast %cst_29 : f32 to vector<8x128xf32>
      %c0_30 = arith.constant 0 : index
      %c0_31 = arith.constant 0 : index
      %40 = vector.load %arg7[%c0_30, %c0_31] : memref<8x128xf32, #tpu.memory_space<vmem>>, vector<8x128xf32>
      tpu.vector_store %arg7[%c0_30, %c0_31], %39 {strides = array<i32>} : memref<8x128xf32, #tpu.memory_space<vmem>>, vector<8x128xf32>,
      %cst_32 = arith.constant 0.000000e+00 : f32
      %41 = vector.broadcast %cst_32 : f32 to vector<8x128xf32>
      %c0_33 = arith.constant 0 : index
      %c0_34 = arith.constant 0 : index
      %42 = vector.load %arg8[%c0_33, %c0_34] : memref<8x128xf32, #tpu.memory_space<vmem>>, vector<8x128xf32>
      tpu.vector_store %arg8[%c0_33, %c0_34], %41 {strides = array<i32>} : memref<8x128xf32, #tpu.memory_space<vmem>>, vector<8x128xf32>,
    } else {
    }
    %cst = arith.constant 0.000000e+00 : f32
    %3 = vector.broadcast %cst : f32 to vector<8x128xf32>
    %cst_1 = arith.constant 0.000000e+00 : f32
    %4 = vector.broadcast %cst_1 : f32 to vector<8x128xf32>
    %cst_2 = arith.constant 0.000000e+00 : f32
    %5 = vector.broadcast %cst_2 : f32 to vector<8x128xf32>
    %c0 = arith.constant 0 : index
    %c0_3 = arith.constant 0 : index
    %6 = vector.load %arg2[%c0, %c0_3] : memref<16x128xf32, #tpu.memory_space<vmem>>, vector<16x128xf32>
    %7 = arith.negf %6 : vector<16x128xf32>
    %8 = math.exp %7 : vector<16x128xf32>
    %cst_4 = arith.constant 1.000000e+00 : f32
    %9 = vector.broadcast %cst_4 : f32 to vector<16x128xf32>
    %10 = arith.addf %9, %8 : vector<16x128xf32>
    %11 = arith.divf %9, %10 : vector<16x128xf32>
    %c0_5 = arith.constant 0 : index
    %c0_6 = arith.constant 0 : index
    %12 = vector.load %arg4[%c0_5, %c0_6] : memref<16x128xf32, #tpu.memory_space<vmem>>, vector<16x128xf32>
    %13 = arith.mulf %11, %12 : vector<16x128xf32>
    %c0_7 = arith.constant 0 : index
    %c0_8 = arith.constant 0 : index
    %14 = vector.load %arg3[%c0_7, %c0_8] : memref<16x128xf32, #tpu.memory_space<vmem>>, vector<16x128xf32>
    %15 = arith.mulf %13, %14 : vector<16x128xf32>
    %16 = vector.shape_cast %15 : vector<16x128xf32> to vector<2x8x128xf32>
    %cst_9 = arith.constant dense<0.000000e+00> : vector<8x128xf32>
    %17 = vector.multi_reduction <add>, %16, %cst_9 [0] : vector<2x8x128xf32> to vector<8x128xf32>
    %18 = arith.addf %3, %17 : vector<8x128xf32>
    %19 = vector.shape_cast %13 : vector<16x128xf32> to vector<2x8x128xf32>
    %cst_10 = arith.constant dense<0.000000e+00> : vector<8x128xf32>
    %20 = vector.multi_reduction <add>, %19, %cst_10 [0] : vector<2x8x128xf32> to vector<8x128xf32>
    %21 = arith.addf %4, %20 : vector<8x128xf32>
    %22 = vector.shape_cast %14 : vector<16x128xf32> to vector<2x8x128xf32>
    %cst_11 = arith.constant dense<0.000000e+00> : vector<8x128xf32>
    %23 = vector.multi_reduction <add>, %22, %cst_11 [0] : vector<2x8x128xf32> to vector<8x128xf32>
    %24 = arith.addf %5, %23 : vector<8x128xf32>
    %c0_12 = arith.constant 0 : index
    %c0_13 = arith.constant 0 : index
    %25 = vector.load %arg6[%c0_12, %c0_13] : memref<8x128xf32, #tpu.memory_space<vmem>>, vector<8x128xf32>
    %26 = arith.addf %25, %18 : vector<8x128xf32>
    %c0_14 = arith.constant 0 : index
    %c0_15 = arith.constant 0 : index
    %27 = vector.load %arg6[%c0_14, %c0_15] : memref<8x128xf32, #tpu.memory_space<vmem>>, vector<8x128xf32>
    tpu.vector_store %arg6[%c0_14, %c0_15], %26 {strides = array<i32>} : memref<8x128xf32, #tpu.memory_space<vmem>>, vector<8x128xf32>,
    %c0_16 = arith.constant 0 : index
    %c0_17 = arith.constant 0 : index
    %28 = vector.load %arg7[%c0_16, %c0_17] : memref<8x128xf32, #tpu.memory_space<vmem>>, vector<8x128xf32>
    %29 = arith.addf %28, %21 : vector<8x128xf32>
    %c0_18 = arith.constant 0 : index
    %c0_19 = arith.constant 0 : index
    %30 = vector.load %arg7[%c0_18, %c0_19] : memref<8x128xf32, #tpu.memory_space<vmem>>, vector<8x128xf32>
    tpu.vector_store %arg7[%c0_18, %c0_19], %29 {strides = array<i32>} : memref<8x128xf32, #tpu.memory_space<vmem>>, vector<8x128xf32>,
    %c0_20 = arith.constant 0 : index
    %c0_21 = arith.constant 0 : index
    %31 = vector.load %arg8[%c0_20, %c0_21] : memref<8x128xf32, #tpu.memory_space<vmem>>, vector<8x128xf32>
    %32 = arith.addf %31, %24 : vector<8x128xf32>
    %c0_22 = arith.constant 0 : index
    %c0_23 = arith.constant 0 : index
    %33 = vector.load %arg8[%c0_22, %c0_23] : memref<8x128xf32, #tpu.memory_space<vmem>>, vector<8x128xf32>
    tpu.vector_store %arg8[%c0_22, %c0_23], %32 {strides = array<i32>} : memref<8x128xf32, #tpu.memory_space<vmem>>, vector<8x128xf32>,
    %c0_i32_24 = arith.constant 0 : i32
    %34 = arith.cmpi eq, %arg1, %c0_i32_24 : i32
    %35 = arith.extui %34 : i1 to i32
    %c0_i32_25 = arith.constant 0 : i32
    %36 = arith.cmpi ne, %35, %c0_i32_25 : i32
    scf.if %36 {
      %c0_26 = arith.constant 0 : index
      %c0_27 = arith.constant 0 : index
      %37 = vector.load %arg6[%c0_26, %c0_27] : memref<8x128xf32, #tpu.memory_space<vmem>>, vector<8x128xf32>
      %c0_28 = arith.constant 0 : index
      %c0_29 = arith.constant 0 : index
      %c0_30 = arith.constant 0 : index
      %c0_31 = arith.constant 0 : index
      %38 = vector.load %arg5[%c0_28, %c0_29, %c0_30, %c0_31] : memref<1x3x8x128xf32, #tpu.memory_space<vmem>>, vector<1x1x8x128xf32>
      %39 = vector.shape_cast %38 : vector<1x1x8x128xf32> to vector<8x128xf32>
      %40 = vector.shape_cast %37 : vector<8x128xf32> to vector<1x1x8x128xf32>
      tpu.vector_store %arg5[%c0_28, %c0_29, %c0_30, %c0_31], %40 {strides = array<i32>} : memref<1x3x8x128xf32, #tpu.memory_space<vmem>>, vector<1x1x8x128xf32>,
      %c0_32 = arith.constant 0 : index
      %c0_33 = arith.constant 0 : index
      %41 = vector.load %arg7[%c0_32, %c0_33] : memref<8x128xf32, #tpu.memory_space<vmem>>, vector<8x128xf32>
      %c0_34 = arith.constant 0 : index
      %c1 = arith.constant 1 : index
      %c0_35 = arith.constant 0 : index
      %c0_36 = arith.constant 0 : index
      %42 = vector.load %arg5[%c0_34, %c1, %c0_35, %c0_36] : memref<1x3x8x128xf32, #tpu.memory_space<vmem>>, vector<1x1x8x128xf32>
      %43 = vector.shape_cast %42 : vector<1x1x8x128xf32> to vector<8x128xf32>
      %44 = vector.shape_cast %41 : vector<8x128xf32> to vector<1x1x8x128xf32>
      tpu.vector_store %arg5[%c0_34, %c1, %c0_35, %c0_36], %44 {strides = array<i32>} : memref<1x3x8x128xf32, #tpu.memory_space<vmem>>, vector<1x1x8x128xf32>,
      %c0_37 = arith.constant 0 : index
      %c0_38 = arith.constant 0 : index
      %45 = vector.load %arg8[%c0_37, %c0_38] : memref<8x128xf32, #tpu.memory_space<vmem>>, vector<8x128xf32>
      %c0_39 = arith.constant 0 : index
      %c2 = arith.constant 2 : index
      %c0_40 = arith.constant 0 : index
      %c0_41 = arith.constant 0 : index
      %46 = vector.load %arg5[%c0_39, %c2, %c0_40, %c0_41] : memref<1x3x8x128xf32, #tpu.memory_space<vmem>>, vector<1x1x8x128xf32>
      %47 = vector.shape_cast %46 : vector<1x1x8x128xf32> to vector<8x128xf32>
      %48 = vector.shape_cast %45 : vector<8x128xf32> to vector<1x1x8x128xf32>
      tpu.vector_store %arg5[%c0_39, %c2, %c0_40, %c0_41], %48 {strides = array<i32>} : memref<1x3x8x128xf32, #tpu.memory_space<vmem>>, vector<1x1x8x128xf32>,
    } else {
    }
    return
  }
  func.func @transform_0(%arg0: i32, %arg1: i32) -> (i32, i32) {
    %c1_i32 = arith.constant 1 : i32
    %0 = arith.muli %arg0, %c1_i32 : i32
    %1 = arith.addi %0, %arg1 : i32
    %c0_i32 = arith.constant 0 : i32
    %2 = arith.minsi %1, %c0_i32 : i32
    %c0_i32_0 = arith.constant 0 : i32
    %c0_i32_1 = arith.constant 0 : i32
    return %2, %c0_i32_0 : i32, i32
  }
  func.func @transform_1(%arg0: i32, %arg1: i32) -> (i32, i32) {
    %c1_i32 = arith.constant 1 : i32
    %0 = arith.muli %arg0, %c1_i32 : i32
    %1 = arith.addi %0, %arg1 : i32
    %c0_i32 = arith.constant 0 : i32
    %2 = arith.minsi %1, %c0_i32 : i32
    %c0_i32_0 = arith.constant 0 : i32
    %c0_i32_1 = arith.constant 0 : i32
    return %2, %c0_i32_0 : i32, i32
  }
  func.func @transform_2(%arg0: i32, %arg1: i32) -> (i32, i32) {
    %c1_i32 = arith.constant 1 : i32
    %0 = arith.muli %arg0, %c1_i32 : i32
    %1 = arith.addi %0, %arg1 : i32
    %c0_i32 = arith.constant 0 : i32
    %2 = arith.minsi %1, %c0_i32 : i32
    %c0_i32_0 = arith.constant 0 : i32
    %c0_i32_1 = arith.constant 0 : i32
    return %2, %c0_i32_0 : i32, i32
  }
  func.func @transform_3(%arg0: i32, %arg1: i32) -> (i32, i32, i32, i32) {
    %c0_i32 = arith.constant 0 : i32
    %c0_i32_0 = arith.constant 0 : i32
    %c0_i32_1 = arith.constant 0 : i32
    %c0_i32_2 = arith.constant 0 : i32
    return %arg0, %c0_i32, %c0_i32_0, %c0_i32_1 : i32, i32, i32, i32
  }
}

</mosaic_0001>

<bundles_post_ra>
// kernel: tpu_custom_call.1
= control target key start
LH: loop header
LB: loop body
LE: loop exit
PB: predicated region body
PF: predicated region fallthrough
CT: control target
= control target key end

     0   :  { %8 = vsyncpa [#allocation6], 0  ;;  %s368_s0 = inlined_call_operand.hbm [shape: f32[16,128], index: 0, kind: input, shape index: {}]   ;;  %s369_s1 = inlined_call_operand.hbm [shape: f32[16,128], index: 1, kind: input, shape index: {}]   ;;  %s370_s2 = inlined_call_operand.hbm [shape: f32[16,128], index: 2, kind: input, shape index: {}]   ;;  %s371_s3 = inlined_call_operand.hbm [shape: f32[1,3,8,128], index: 3, kind: output, shape index: {}]  }
   0x1   :  { %9 = vsyncpa [#allocation9], 0 }
   0x2   :  { %10 = vsyncpa [#allocation7], 0  ;;  %s275_s12 = smov [#allocation8]   ;;  %s276_s14 = smov [#allocation5]  }
   0x3   :  { %s40_s13 = sshll.u32 %s275_s12, 4  ;;  %s22_s15 = sshll.u32 %s276_s14, 4  ;;  %s41_s13 = int_to_ptr.vmem [resolvable:$true] %s40_s13  ;;  %s301_s15 = int_to_ptr.vmem [resolvable:$true] %s22_s15 }
   0x4   :  { %s181_s18 = scalar_lea.hbm %s369_s1, 256 }
   0x5   :  { %p182_p0 = scmp.ne.s32.totalorder %s369_s1, %s181_s18  ;;  %p185_p1 = scmp.lt.u32.totalorder %s181_s18, %s369_s1 }
   0x7   :  { %p187_p2 = pnand %p185_p1, %p182_p0 }
   0x9   :  { %190 = shalt.err (!%p187_p2)
}
   0xa   :  { %s191_s23 = scalar_lea.vmem %s41_s13, 256  ;;  %p196_p4 = scmp.lt.s32.totalorder %s41_s13, %s41_s13 }
   0xb   :  { %p192_p3 = scmp.ne.s32.totalorder %s41_s13, %s191_s23  ;;  %p197_p5 = scmp.lt.s32.totalorder %s191_s23, %s191_s23 }
   0xd   :  { %p198_p6 = por %p197_p5, %p196_p4 }
   0xf   :  { %p199_p7 = pnand %p198_p6, %p192_p3 }
  0x11   :  { %202 = shalt.err (!%p199_p7)
}
  0x12   :  { %s277_s24 = smov 128   ;;  %s278_s25 = smov 8  }
  0x13   :  { %46 = dma.hbm_to_vmem [thread:$0]  %s369_s1, 256, %s41_s13, [#allocation9], %s277_s24, %s277_s24, %s278_s25  }
  0x14   :  { %s203_s30 = scalar_lea.hbm %s368_s0, 256 }
  0x15   :  { %p204_p8 = scmp.ne.s32.totalorder %s368_s0, %s203_s30  ;;  %p207_p9 = scmp.lt.u32.totalorder %s203_s30, %s368_s0 }
  0x17   :  { %p209_p10 = pnand %p207_p9, %p204_p8 }
  0x19   :  { %212 = shalt.err (!%p209_p10)
}
  0x1a   :  { %s213_s8 = scalar_lea.vmem %s301_s15, 256  ;;  %p218_p12 = scmp.lt.s32.totalorder %s301_s15, %s301_s15 }
  0x1b   :  { %p214_p11 = scmp.ne.s32.totalorder %s301_s15, %s213_s8  ;;  %p219_p13 = scmp.lt.s32.totalorder %s213_s8, %s213_s8 }
  0x1d   :  { %p220_p0 = por %p219_p13, %p218_p12 }
  0x1f   :  { %p221_p1 = pnand %p220_p0, %p214_p11 }
  0x21   :  { %224 = shalt.err (!%p221_p1)
}
  0x22   :  { %28 = dma.hbm_to_vmem [thread:$0]  %s368_s0, 256, %s301_s15, [#allocation6], %s277_s24, %s277_s24, %s278_s25  }
  0x23   :  { %s279_s10 = smov [#allocation10]   ;;  %s225_s14 = scalar_lea.hbm %s370_s2, 256 }
  0x24   :  { %s58_s11 = sshll.u32 %s279_s10, 4  ;;  %p226_p2 = scmp.ne.s32.totalorder %s370_s2, %s225_s14  ;;  %s59_s11 = int_to_ptr.vmem [resolvable:$true] %s58_s11 }
  0x25   :  { %p229_p3 = scmp.lt.u32.totalorder %s225_s14, %s370_s2 }
  0x27   :  { %p231_p4 = pnand %p229_p3, %p226_p2 }
  0x29   :  { %234 = shalt.err (!%p231_p4)
}
  0x2a   :  { %s235_s20 = scalar_lea.vmem %s59_s11, 256  ;;  %p240_p6 = scmp.lt.s32.totalorder %s59_s11, %s59_s11 }
  0x2b   :  { %p236_p5 = scmp.ne.s32.totalorder %s59_s11, %s235_s20  ;;  %p241_p7 = scmp.lt.s32.totalorder %s235_s20, %s235_s20 }
  0x2d   :  { %p242_p8 = por %p241_p7, %p240_p6 }
  0x2f   :  { %p243_p9 = pnand %p242_p8, %p236_p5 }
  0x31   :  { %246 = shalt.err (!%p243_p9)
}
  0x32   :  { %64 = dma.hbm_to_vmem [thread:$0]  %s370_s2, 256, %s59_s11, [#allocation9], %s277_s24, %s277_s24, %s278_s25  }
  0x33   :  { %269 = dma.done.wait [#allocation6], 256  }
  0x34   :  { %270 = vsyncadd [#allocation6], 4294967040 }
  0x35   :  { %271 = dma.done.wait [#allocation9], 512  }
  0x36   :  { %272 = vsyncadd [#allocation9], 4294966784  ;;  %v93_v0 = vld [vmem:[#allocation5] sm:$0xff]  ;;  %v94_v1 = vld [vmem:[#allocation5 + $0x8] sm:$0xff]  ;;  %s280_s2 = smov [#allocation11]  }
  0x37   :  { %v165_v2 = vmul.f32 -1.442695, %v93_v0  ;;  %v166_v3 = vmul.f32 -1.442695, %v94_v1  ;;  %v111_v4 = vld [vmem:[#allocation8] sm:$0xff]  ;;  %v112_v5 = vld [vmem:[#allocation8 + $0x8] sm:$0xff] }
  0x38   :  { %v119_v6 = vadd.f32 %v112_v5, %v111_v4  ;;  %v107_v11 = vld [vmem:[#allocation10] sm:$0xff]  ;;  %v108_v12 = vld [vmem:[#allocation10 + $0x8] sm:$0xff]  ;;  %s146_s21 = sshll.u32 %s280_s2, 4  ;;  %s147_s21 = int_to_ptr.vmem [resolvable:$true] %s146_s21 }
  0x39   :  { %173 = vpow2.f32 %v165_v2  ;;  %s247_s22 = scalar_lea.vmem %s147_s21, 384  ;;  %p252_p11 = scmp.lt.s32.totalorder %s147_s21, %s147_s21 }
  0x3a   :  { %175 = vpow2.f32 %v166_v3  ;;  %140 = vst [vmem:[#allocation11 + $0x10] sm:$0xff] %v119_v6  ;;  %p248_p10 = scmp.ne.s32.totalorder %s147_s21, %s247_s22  ;;  %p253_p12 = scmp.lt.s32.totalorder %s247_s22, %s247_s22 }
  0x3c   :  { %p254_p13 = por %p253_p12, %p252_p11 }
  0x3e   :  { %p255_p0 = pnand %p254_p13, %p248_p10 }
  0x43   :  { %v174_v7 = vpop.eup %173 }
  0x44   :  { %v176_v8 = vpop.eup %175  ;;  %v101_v9 = vadd.f32 1.0, %v174_v7 }
  0x45   :  { %v102_v10 = vadd.f32 1.0, %v176_v8 }
  0x46   :  { %177 = vrcp.f32 %v101_v9 }
  0x47   :  { %179 = vrcp.f32 %v102_v10 }
  0x50   :  { %v178_v13 = vpop.eup %177 }
  0x51   :  { %v180_v14 = vpop.eup %179  ;;  %v109_v15 = vmul.f32 %v178_v13, %v107_v11 }
  0x52   :  { %v110_v16 = vmul.f32 %v180_v14, %v108_v12 }
  0x53   :  { %v113_v17 = vmul.f32 %v111_v4, %v109_v15 }
  0x54   :  { %v114_v18 = vmul.f32 %v112_v5, %v110_v16  ;;  %v117_v19 = vadd.f32 %v110_v16, %v109_v15 }
  0x56   :  { %v115_v20 = vadd.f32 %v114_v18, %v113_v17  ;;  %137 = vst [vmem:[#allocation11 + $0x8] sm:$0xff] %v117_v19 }
  0x58   :  { %134 = vst [vmem:[#allocation11] sm:$0xff] %v115_v20 }
  0x59   :  { %258 = shalt.err (!%p255_p0)
}
  0x5a   :  { %s259_s27 = scalar_lea.hbm %s371_s3, 384 }
  0x5b   :  { %p260_p1 = scmp.ne.s32.totalorder %s371_s3, %s259_s27  ;;  %p263_p2 = scmp.lt.u32.totalorder %s259_s27, %s371_s3 }
  0x5d   :  { %p265_p3 = pnand %p263_p2, %p260_p1 }
  0x5f   :  { %268 = shalt.err (!%p265_p3)
}
  0x60   :  { %152 = dma.vmem_to_hbm [thread:$0]  %s147_s21, 384, %s371_s3, [#allocation7], %s277_s24, %s277_s24, %s278_s25  }
  0x61   :  { %273 = dma.done.wait [#allocation7], 384  }
  0x62   :  { %274 = vsyncadd [#allocation7], 4294966912 }
  0x63   :  { %156 = vsyncpa [#allocation6], 1 }
  0x64   :  { %157 = vsyncpa [#allocation9], 1 }
  0x65   :  { %158 = vsyncpa [#allocation7], 1 }

</bundles_post_ra>
